<compile_context>
chip_gen: v7x
topology: tpu7x:2x2x1
jax: 0.10.0
libtpu: 0.0.40
codegen_flags: <defaults>
</compile_context>

<pallas_src>
import math
import functools

import jax
import jax.numpy as jnp
from jax.experimental import pallas as pl
from jax.experimental.pallas import tpu as pltpu


def _cdiv(a: int, b: int) -> int:
    return -(-a // b)


def _pe_add_kernel(x_ref, w_ref, phase_ref, o_ref, *, batch: int, tile_s: int):
    """x block: (tile_s, B*D); w/phase: (1, D) f32 per-feature constants."""
    i = pl.program_id(0)
    x = x_ref[...]
    w = w_ref[...]                  # (1, D) frequency per feature
    phase = phase_ref[...]          # (1, D): 0 for even features, pi/2 for odd

    # Absolute sequence position of every row in this block.
    pos0 = (i * tile_s).astype(jnp.float32)
    pos = jax.lax.broadcasted_iota(
        jnp.int32, (x.shape[0], 1), 0).astype(jnp.float32) + pos0

    # One sin per (row, feature) -- NOT per batch element.
    pe = jnp.sin(pos * w + phase)                    # (tile_s, D), f32
    pe = pe.astype(x.dtype)
    # Lane-replicate across the batch (cheap copy, no extra transcendentals).
    o_ref[...] = x + jnp.tile(pe, (1, batch))


def fixed_positional_encoding(x: jax.Array, *, max_len: int = 5000,
                              block_bytes: int = 8 << 20) -> jax.Array:
    """x: (S, B, d_model). Returns x + pe[:S] (sinusoidal PE, broadcast over B)."""
    S, B, D = x.shape
    assert D % 2 == 0, "d_model must be even"
    assert S <= max_len

    bd = B * D
    x_flat = x.reshape(S, bd)          # contiguous -> free reshape, lane axis = B*D

    # Per-feature constants (hoisted out of the kernel's sequential grid loop).
    feat = jnp.arange(D, dtype=jnp.int32)
    w = jnp.exp(((feat // 2) * 2).astype(jnp.float32)
                * jnp.float32(-math.log(10000.0) / D))[None, :]          # (1, D)
    phase = ((feat % 2).astype(jnp.float32)
             * jnp.float32(math.pi / 2.0))[None, :]                      # (1, D)

    # ---- tile-size selection -------------------------------------------------
    itemsize = x.dtype.itemsize
    sublane = max(8, 32 // itemsize)            # 8 f32 / 16 bf16 / 32 int8|fp8
    row_bytes = bd * itemsize

    try:                                        # generation-aware VMEM budget
        phys_vmem = pltpu.get_tpu_info().vmem_capacity_bytes
    except Exception:
        phys_vmem = 64 << 20                    # conservative (v7x-sized)
    vmem_limit = min(64 << 20, phys_vmem // 2)  # ~32 MiB on v7x, 64 MiB on v5e/v6e

    # Live VMEM per in-flight block ~= 2*in + 2*out (double buffers) + 1 pe temp.
    budget_rows = max(1, int(0.8 * vmem_limit) // (5 * row_bytes))
    target_rows = max(1, block_bytes // row_bytes)
    tile_s = min(S, target_rows, budget_rows)
    if tile_s < S:
        tile_s = max(sublane, (tile_s // sublane) * sublane)
        tile_s = min(tile_s, S)
    # TODO(synk): if a single (B*d_model) row exceeds the VMEM budget, the lane
    # axis would also need tiling; not implemented (no realistic shape hits it).

    grid_len = _cdiv(S, tile_s)
    # Prefer an even grid so v7x's two TensorCores split the parallel axis evenly.
    if grid_len > 1 and grid_len % 2 == 1 and tile_s > sublane:
        cand = _cdiv(_cdiv(S, grid_len + 1), sublane) * sublane
        if sublane <= cand <= tile_s and _cdiv(S, cand) % 2 == 0:
            tile_s, grid_len = cand, _cdiv(S, cand)

    kernel = functools.partial(_pe_add_kernel, batch=B, tile_s=tile_s)

    out_flat = pl.pallas_call(
        kernel,
        out_shape=jax.ShapeDtypeStruct((S, bd), x.dtype),
        grid=(grid_len,),
        in_specs=[pl.BlockSpec((tile_s, bd), lambda i: (i, 0)),
                  pl.BlockSpec((1, D), lambda i: (0, 0)),
                  pl.BlockSpec((1, D), lambda i: (0, 0))],
        out_specs=pl.BlockSpec((tile_s, bd), lambda i: (i, 0)),
        input_output_aliases={0: 0},            # x += pe; x is donated
        compiler_params=pltpu.CompilerParams(
            dimension_semantics=("parallel",),  # shard the S axis across cores
            vmem_limit_bytes=vmem_limit,
        ),
    )(x_flat, w, phase)
    return out_flat.reshape(S, B, D)


def _reference_pe(S, d_model, dtype=jnp.float32):
    # Pure-JAX reference mirroring the PyTorch buffer construction.
    position = jnp.arange(S, dtype=jnp.float32)[:, None]
    div_term = jnp.exp(jnp.arange(0, d_model, 2, dtype=jnp.float32)
                       * (-math.log(10000.0) / d_model))
    pe = jnp.zeros((S, d_model), jnp.float32)
    pe = pe.at[:, 0::2].set(jnp.sin(position * div_term))
    pe = pe.at[:, 1::2].set(jnp.cos(position * div_term))
    return pe[:, None, :].astype(dtype)  # (S, 1, d_model)


if __name__ == "__main__":
    # Small shapes implied by the forward: x is (seq_len, batch, d_model).
    S, B, D = 8, 2, 32
    key = jax.random.PRNGKey(0)
    x = jax.random.normal(key, (S, B, D), dtype=jnp.float32)

    # Compute the reference BEFORE the kernel call (the kernel donates x).
    ref = x + _reference_pe(S, D)

    out = fixed_positional_encoding(x)
    out = jax.block_until_ready(out)

    assert out.shape == (S, B, D)
    err = float(jnp.max(jnp.abs(out - ref)))
    assert err < 1e-5, err

    print("KERNEL_OK")
</pallas_src>

<mosaic_0001>
module attributes {stable_mosaic.version = 11 : i64} {
  func.func @_pe_add_kernel(%arg0: i32, %arg1: memref<8x64xf32, #tpu.memory_space<vmem>>, %arg2: memref<1x32xf32, #tpu.memory_space<vmem>>, %arg3: memref<1x32xf32, #tpu.memory_space<vmem>>, %arg4: memref<8x64xf32, #tpu.memory_space<vmem>>) attributes {dimension_semantics = [#tpu.dimension_semantics<parallel>], iteration_bounds = array<i64: 1>, scalar_prefetch = 0 : i64, scratch_operands = 0 : i64, tpu.core_type = #tpu.core_type<tc>, window_params = [{transform_indices = @transform_0, window_bounds = array<i64: 8, 64>}, {pipeline_mode = #tpu.pipeline_mode<synchronous>, transform_indices = @transform_1, window_bounds = array<i64: 1, 32>}, {pipeline_mode = #tpu.pipeline_mode<synchronous>, transform_indices = @transform_2, window_bounds = array<i64: 1, 32>}, {transform_indices = @transform_3, window_bounds = array<i64: 8, 64>}]} {
    %c0 = arith.constant 0 : index
    %c0_0 = arith.constant 0 : index
    %0 = vector.load %arg1[%c0, %c0_0] : memref<8x64xf32, #tpu.memory_space<vmem>>, vector<8x64xf32>
    %c0_1 = arith.constant 0 : index
    %c0_2 = arith.constant 0 : index
    %1 = vector.load %arg2[%c0_1, %c0_2] : memref<1x32xf32, #tpu.memory_space<vmem>>, vector<1x32xf32>
    %c0_3 = arith.constant 0 : index
    %c0_4 = arith.constant 0 : index
    %2 = vector.load %arg3[%c0_3, %c0_4] : memref<1x32xf32, #tpu.memory_space<vmem>>, vector<1x32xf32>
    %c8_i32 = arith.constant 8 : i32
    %3 = arith.muli %arg0, %c8_i32 : i32
    %4 = arith.sitofp %3 : i32 to f32
    %5 = tpu.iota {dimensions = array<i32: 0>} : vector<8x1xi32>
    %6 = arith.sitofp %5 : vector<8x1xi32> to vector<8x1xf32>
    %7 = vector.broadcast %4 : f32 to vector<8x1xf32>
    %8 = arith.addf %6, %7 : vector<8x1xf32>
    %9 = vector.broadcast %8 : vector<8x1xf32> to vector<8x32xf32>
    %10 = vector.broadcast %1 : vector<1x32xf32> to vector<8x32xf32>
    %11 = arith.mulf %9, %10 : vector<8x32xf32>
    %12 = vector.broadcast %2 : vector<1x32xf32> to vector<8x32xf32>
    %13 = arith.addf %11, %12 : vector<8x32xf32>
    %14 = math.sin %13 : vector<8x32xf32>
    %15 = tpu.concatenate %14, %14 in 1 : vector<8x32xf32>, vector<8x32xf32> -> vector<8x64xf32>
    %16 = arith.addf %0, %15 : vector<8x64xf32>
    %c0_5 = arith.constant 0 : index
    %c0_6 = arith.constant 0 : index
    %17 = vector.load %arg4[%c0_5, %c0_6] : memref<8x64xf32, #tpu.memory_space<vmem>>, vector<8x64xf32>
    tpu.vector_store %arg4[%c0_5, %c0_6], %16 {strides = array<i32>} : memref<8x64xf32, #tpu.memory_space<vmem>>, vector<8x64xf32>,
    return
  }
  func.func @transform_0(%arg0: i32) -> (i32, i32) {
    %c0_i32 = arith.constant 0 : i32
    %c0_i32_0 = arith.constant 0 : i32
    return %arg0, %c0_i32 : i32, i32
  }
  func.func @transform_1(%arg0: i32) -> (i32, i32) {
    %c0_i32 = arith.constant 0 : i32
    %c0_i32_0 = arith.constant 0 : i32
    %c0_i32_1 = arith.constant 0 : i32
    return %c0_i32, %c0_i32_0 : i32, i32
  }
  func.func @transform_2(%arg0: i32) -> (i32, i32) {
    %c0_i32 = arith.constant 0 : i32
    %c0_i32_0 = arith.constant 0 : i32
    %c0_i32_1 = arith.constant 0 : i32
    return %c0_i32, %c0_i32_0 : i32, i32
  }
  func.func @transform_3(%arg0: i32) -> (i32, i32) {
    %c0_i32 = arith.constant 0 : i32
    %c0_i32_0 = arith.constant 0 : i32
    return %arg0, %c0_i32 : i32, i32
  }
}

</mosaic_0001>

<bundles_post_ra>
// kernel: tpu_custom_call.1
= control target key start
LH: loop header
LB: loop body
LE: loop exit
PB: predicated region body
PF: predicated region fallthrough
CT: control target
= control target key end

     0   :  { %8 = vsyncpa [#allocation3], 0  ;;  %s330_s0 = inlined_call_operand.hbm [shape: f32[8,64], index: 0, kind: input, shape index: {}, may-alias: {0,3}]   ;;  %s331_s1 = inlined_call_operand.vmem [shape: f32[1,32], index: 1, kind: input, shape index: {}]   ;;  %s332_s2 = inlined_call_operand.vmem [shape: f32[1,32], index: 2, kind: input, shape index: {}]   ;;  %s333_s3 = inlined_call_operand.hbm [shape: f32[8,64], index: 3, kind: output, shape index: {}, may-alias: {0,3}]  }
   0x1   :  { %9 = vsyncpa [#allocation4], 0  ;;  %s250_s12 = smov [#allocation2]   ;;  %s202_s16 = scalar_lea.hbm %s330_s0, 128 }
   0x2   :  { %s16_s13 = sshll.u32 %s250_s12, 4  ;;  %p203_p0 = scmp.ne.s32.totalorder %s330_s0, %s202_s16  ;;  %s17_s13 = int_to_ptr.vmem [resolvable:$true] %s16_s13 }
   0x3   :  { %p206_p1 = scmp.lt.u32.totalorder %s202_s16, %s330_s0 }
   0x5   :  { %p208_p2 = pnand %p206_p1, %p203_p0 }
   0x7   :  { %211 = shalt.err (!%p208_p2)
}
   0x8   :  { %s212_s21 = scalar_lea.vmem %s17_s13, 128  ;;  %p217_p4 = scmp.lt.s32.totalorder %s17_s13, %s17_s13 }
   0x9   :  { %p213_p3 = scmp.ne.s32.totalorder %s17_s13, %s212_s21  ;;  %p218_p5 = scmp.lt.s32.totalorder %s212_s21, %s212_s21 }
   0xb   :  { %p219_p6 = por %p218_p5, %p217_p4 }
   0xd   :  { %p220_p7 = pnand %p219_p6, %p213_p3 }
   0xf   :  { %223 = shalt.err (!%p220_p7)
}
  0x10   :  { %19 = dma.hbm_to_vmem [thread:$0]  %s330_s0, 128, %s17_s13, [#allocation3]  }
  0x11   :  { %246 = dma.done.wait [#allocation3], 128  }
  0x12   :  { %247 = vsyncadd [#allocation3], 4294967168  ;;  %v32_v0 = vlaneseq  ;;  %v179_v3 = vld [vmem:[%s331_s1] ss:$0 sm:$0xff]  ;;  %v251_v18 = vmov 683565275  }
  0x13   :  { %v180_v4 = vld [vmem:[%s332_s2] ss:$0 sm:$0xff]  ;;  %v252_v20 = vmov 2475754826   ;;  %v253_v22 = vmov 2131351028  }
  0x14   :  { %v33_v1 = vshrl.u32 %v32_v0, 7  ;;  %v254_v24 = vmov 2102212464   ;;  %v255_v26 = vmov 920167782   ;;  %s257_s0 = smov 32  }
  0x15   :  { %v256_v33 = vmov 1326507024   ;;  %vm159_vm13 = vcmask 261120   ;;  %s258_s1 = smov [#allocation5]   ;;  %vm162_vm14 = vcmask 523264  }
  0x16   :  { %v34_v2 = vcvt.s32.f32 %v33_v1  ;;  %s170_s2 = sshll.u32 %s258_s1, 4  ;;  %s171_s2 = int_to_ptr.vmem [resolvable:$true] %s170_s2 }
  0x17   :  { %s224_s28 = scalar_lea.vmem %s171_s2, 128  ;;  %p229_p9 = scmp.lt.s32.totalorder %s171_s2, %s171_s2 }
  0x18   :  { %v43_v5 = vmul.f32 %v179_v3, %v34_v2  ;;  %p225_p8 = scmp.ne.s32.totalorder %s171_s2, %s224_s28  ;;  %p230_p10 = scmp.lt.s32.totalorder %s224_s28, %s224_s28 }
  0x1a   :  { %v297_v6 = vadd.f32 %v180_v4, %v43_v5  ;;  %p231_p11 = por %p230_p10, %p229_p9 }
  0x1c   :  { %v54_v7 = vand.u32 2139095040, %v297_v6  ;;  %v51_v9 = vand.u32 2147483647, %v297_v6  ;;  %vm53_vm7 = vcmp.lt.s32.totalorder %v297_v6, 0  ;;  %vm143_vm12 = vweird.f32 %v297_v6  ;;  %p232_p12 = pnand %p231_p11, %p225_p8 }
  0x1e   :  { %v55_v8 = vshrl.u32 %v54_v7, 23  ;;  %v58_v12 = vand.u32 8388607, %v51_v9  ;;  %vm52_vm8 = vcmp.le.f32.partialorder %v51_v9, 0.7853982 }
  0x20   :  { %v181_v10 = vadd.s32 4294967169, %v55_v8  ;;  %v59_v15 = vor.u32 8388608, %v58_v12 }
  0x22   :  { %v61_v11 = vadd.s32 1, %v181_v10  ;;  %v99_v35 = vshll.u32 %v59_v15, 8 }
  0x24   :  { %vm62_vm0 = vcmp.gt.s32.totalorder %v61_v11, 0 }
  0x25   :  { %v63_v13 = vsel %vm62_vm0, %v61_v11, 0 }
  0x26   :  { %v65_v14 = vand.u32 31, %v63_v13  ;;  %v64_v16 = vshrl.u32 %v63_v13, 5 }
  0x28   :  { %v66_v17 = vsub.s32 32, %v65_v14  ;;  %v68_v19 = vshll.u32 %v251_v18, %v65_v14  ;;  %v71_v21 = vshll.u32 %v252_v20, %v65_v14  ;;  %v74_v23 = vshll.u32 %v253_v22, %v65_v14 }
  0x29   :  { %v77_v25 = vshll.u32 %v254_v24, %v65_v14  ;;  %v80_v27 = vshll.u32 %v255_v26, %v65_v14  ;;  %vm83_vm1 = vcmp.lt.s32.totalorder %v64_v16, 1  ;;  %vm86_vm2 = vcmp.lt.s32.totalorder %v64_v16, 4 }
  0x2a   :  { %v67_v28 = vshrl.u32 %v251_v18, %v66_v17  ;;  %v69_v29 = vshrl.u32 %v252_v20, %v66_v17  ;;  %v72_v30 = vshrl.u32 %v253_v22, %v66_v17  ;;  %v75_v31 = vshrl.u32 %v254_v24, %v66_v17 }
  0x2b   :  { %v78_v32 = vshrl.u32 %v255_v26, %v66_v17  ;;  %v81_v34 = vshrl.u32 %v256_v33, %v66_v17  ;;  %vm84_vm3 = vcmp.lt.s32.totalorder %v64_v16, 2  ;;  %vm85_vm4 = vcmp.lt.s32.totalorder %v64_v16, 3 }
  0x2c   :  { %v70_v36 = vor.u32 %v69_v29, %v68_v19  ;;  %v73_v37 = vor.u32 %v72_v30, %v71_v21  ;;  %v76_v38 = vor.u32 %v75_v31, %v74_v23 }
  0x2d   :  { %v79_v39 = vor.u32 %v78_v32, %v77_v25  ;;  %v82_v40 = vor.u32 %v81_v34, %v80_v27 }
  0x2e   :  { %v87_v41 = vsel %vm83_vm1, %v67_v28, %v70_v36  ;;  %v88_v42 = vsel %vm86_vm2, %v76_v38, 2102212464  ;;  %v91_v43 = vsel %vm83_vm1, %v70_v36, %v73_v37  ;;  %v95_v44 = vsel %vm83_vm1, %v73_v37, %v76_v38 }
  0x2f   :  { %v89_v45 = vsel %vm85_vm4, %v73_v37, %v88_v42  ;;  %v92_v46 = vsel %vm86_vm2, %v79_v39, 920167782  ;;  %v96_v47 = vsel %vm86_vm2, %v82_v40, 1326507024 }
  0x30   :  { %v93_v48 = vsel %vm85_vm4, %v76_v38, %v92_v46  ;;  %v97_v49 = vsel %vm85_vm4, %v79_v39, %v96_v47  ;;  %v90_v50 = vsel %vm84_vm3, %v87_v41, %v89_v45 }
  0x31   :  { %v94_v51 = vsel %vm84_vm3, %v91_v43, %v93_v48  ;;  %v98_v52 = vsel %vm84_vm3, %v95_v44, %v97_v49  ;;  %v106_v57 = vmul.u32 %v99_v35, %v90_v50 }
  0x32   :  { %v303_v53 = vmul.u32.u64.low %v99_v35, %v98_v52  ;;  %v304_v54 = vmul.u32.u64.high %v99_v35, %v98_v52, %v303_v53  ;;  %v306_v55 = vmul.u32.u64.low %v99_v35, %v94_v51  ;;  %v307_v56 = vmul.u32.u64.high %v99_v35, %v94_v51, %v306_v55  ;;  %v27_v35 = vld [vmem:[#allocation2] sm:$0xff] }
  0x34   :  { %vm108_vm5 = vc.u32 %v304_v54, %v306_v55  ;;  %v109_v58 = vadd.s32 1, %v307_v56  ;;  %v107_v5 = vadd.s32 %v306_v55, %v304_v54 }
  0x36   :  { %v110_v59 = vsel %vm108_vm5, %v109_v58, %v307_v56 }
  0x37   :  { %v111_v60 = vadd.s32 %v110_v59, %v106_v57 }
  0x39   :  { %v112_v61 = vadd.s32 536870912, %v111_v60 }
  0x3b   :  { %v113_v62 = vshrl.u32 %v112_v61, 30 }
  0x3d   :  { %v114_v63 = vshll.u32 %v113_v62, 30  ;;  %v137_v19 = vsub.s32 4, %v113_v62 }
  0x3f   :  { %v115_v0 = vsub.s32 %v111_v60, %v114_v63  ;;  %v138_v22 = vsel %vm53_vm7, %v137_v19, %v113_v62 }
  0x40   :  { %v140_v25 = vsel %vm52_vm8, 0, %v138_v22 }
  0x41   :  { %v117_v1 = vsub.s32 0, %v115_v0  ;;  %v144_v26 = vadd.s32 3, %v140_v25 }
  0x43   :  { %v182_v2 = vmin.u32 %v117_v1, %v115_v0  ;;  %v145_v27 = vand.u32 3, %v144_v26 }
  0x45   :  { %v119_v3 = vclz %v182_v2  ;;  %vm150_vm9 = vcmp.eq.s32.totalorder %v145_v27, 2  ;;  %vm147_vm10 = vcmp.eq.s32.totalorder %v145_v27, 0  ;;  %vm146_vm11 = vcmp.lt.s32.totalorder %v145_v27, 2 }
  0x47   :  { %v183_v4 = vadd.s32 4294967294, %v119_v3 }
  0x49   :  { %vm184_vm6 = vcmp.lt.s32.totalorder %v183_v4, 0 }
  0x4a   :  { %v122_v7 = vsel %vm184_vm6, 0, %v183_v4 }
  0x4b   :  { %v123_v8 = vsub.s32 32, %v122_v7  ;;  %v124_v10 = vshll.u32 %v115_v0, %v122_v7  ;;  %v127_v11 = vsub.s32 4294967266, %v122_v7 }
  0x4d   :  { %v125_v12 = vshrl.u32 %v107_v5, %v123_v8  ;;  %v128_v13 = vadd.s32 127, %v127_v11 }
  0x4f   :  { %v126_v14 = vor.u32 %v125_v12, %v124_v10  ;;  %v129_v15 = vshll.u32 %v128_v13, 23 }
  0x51   :  { %v130_v16 = vor.u32 4788187, %v129_v15  ;;  %v133_v17 = vcvt.s32.f32 %v126_v14 }
  0x53   :  { %v131_v18 = vand.u32 2147483647, %v130_v16 }
  0x55   :  { %v134_v20 = vmul.f32 %v133_v17, %v131_v18 }
  0x57   :  { %v135_v21 = vxor.u32 2147483648, %v134_v20 }
  0x59   :  { %v136_v23 = vsel %vm53_vm7, %v135_v21, %v134_v20 }
  0x5a   :  { %v139_v24 = vsel %vm52_vm8, %v297_v6, %v136_v23 }
  0x5b   :  { %198 = vcosq.f32 %v139_v24 }
  0x5c   :  { %200 = vsinq.f32 %v139_v24 }
  0x65   :  { %v199_v28 = vpop.eup %198 }
  0x66   :  { %v201_v29 = vpop.eup %200  ;;  %v151_v30 = vxor.u32 2147483648, %v199_v28 }
  0x67   :  { %v148_v31 = vxor.u32 2147483648, %v201_v29 }
  0x68   :  { %v152_v9 = vsel %vm150_vm9, %v151_v30, %v201_v29 }
  0x69   :  { %v149_v32 = vsel %vm147_vm10, %v199_v28, %v148_v31 }
  0x6a   :  { %v153_v33 = vsel %vm146_vm11, %v149_v32, %v152_v9 }
  0x6b   :  { %v154_v34 = vsel %vm143_vm12, nan, %v153_v33 }
  0x6c   :  { %156 = vrot.lane.b32.xlu0 %v154_v34, %s257_s0 }
  0xde   :  { %v157_v36 = vpop.permute.xlu0 %156 }
  0xdf   :  { %v160_v37 = vsel %vm159_vm13, %v154_v34, %v157_v36 }
  0xe0   :  { %v161_v38 = vadd.f32 %v160_v37, %v27_v35 }
  0xe2   :  { %163 = vst.msk [vmem:[#allocation5] sm:$0xff] %vm162_vm14, %v161_v38 }
  0xe3   :  { %235 = shalt.err (!%p232_p12)
}
  0xe4   :  { %s236_s4 = scalar_lea.hbm %s333_s3, 128 }
  0xe5   :  { %p237_p13 = scmp.ne.s32.totalorder %s333_s3, %s236_s4  ;;  %p240_p0 = scmp.lt.u32.totalorder %s236_s4, %s333_s3 }
  0xe7   :  { %p242_p1 = pnand %p240_p0, %p237_p13 }
  0xe9   :  { %245 = shalt.err (!%p242_p1)
}
  0xea   :  { %173 = dma.vmem_to_hbm [thread:$0]  %s171_s2, 128, %s333_s3, [#allocation4]  }
  0xeb   :  { %248 = dma.done.wait [#allocation4], 128  }
  0xec   :  { %249 = vsyncadd [#allocation4], 4294967168 }
  0xed   :  { %177 = vsyncpa [#allocation3], 1 }
  0xee   :  { %178 = vsyncpa [#allocation4], 1 }

</bundles_post_ra>
